<compile_context>
chip_gen: v6e
topology: v6e:2x2x1
jax: 0.10.0
libtpu: 0.0.40
codegen_flags: <defaults>
</compile_context>

<pallas_src>
import math

import jax
import jax.numpy as jnp
from jax import lax
from jax.experimental import pallas as pl
from jax.experimental.pallas import tpu as pltpu

# ArcFace hyper-parameters (match the PyTorch module defaults).
S = 30.0
M = 0.5
COS_M = math.cos(M)
SIN_M = math.sin(M)
TH = math.cos(math.pi - M)
MM = math.sin(math.pi - M) * M
EPS = 1e-12  # F.normalize default eps


def _round_up(a: int, b: int) -> int:
    return ((a + b - 1) // b) * b


def arcface_kernel(xn_ref, w_ref, lab_ref, out_ref, wn_ref):
    """One (TB, TC) output tile.

    xn_ref : (TB, D) bf16  pre-normalized activations (streamed along B)
    w_ref  : (TC, D) f32   raw weight tile (resident across the inner B axis)
    lab_ref: (TB, 1) int32 labels for this row tile
    out_ref: (TB, TC) f32  scaled logits tile
    wn_ref : (TC, D) bf16  VMEM scratch: normalized weight tile
    """
    j = pl.program_id(0)  # class-tile index (outer, "parallel")
    i = pl.program_id(1)  # batch-tile index (inner, "arbitrary")

    # Normalize this weight tile exactly once: it is resident across the inner
    # B axis, so redo the rsqrt/row-reduce only when the class tile changes.
    @pl.when(i == 0)
    def _():
        w = w_ref[...].astype(jnp.float32)
        inv_w = lax.rsqrt(
            jnp.maximum(jnp.sum(w * w, axis=-1, keepdims=True), EPS * EPS)
        )
        wn_ref[...] = (w * inv_w).astype(jnp.bfloat16)

    # cosine = x_n @ w_n^T as an NT contraction; bf16 operands, f32 accumulate.
    cosine = lax.dot_general(
        xn_ref[...], wn_ref[...],
        dimension_numbers=(((1,), (1,)), ((), ())),
        preferred_element_type=jnp.float32,
    )  # (TB, TC) f32

    # Clamp so fp rounding (|cosine| slightly > 1) can't NaN the sqrt.
    sine = jnp.sqrt(jnp.maximum(1.0 - cosine * cosine, 0.0))
    phi = cosine * COS_M - sine * SIN_M
    phi = jnp.where(cosine > TH, phi, cosine - MM)

    # one_hot.scatter_(1, label, 1) blend: shift the label by the tile offset
    # and compare against a loop-invariant LOCAL column iota.
    tb, tc = cosine.shape
    col = lax.broadcasted_iota(jnp.int32, (tb, tc), 1)
    lab_local = lab_ref[...] - j * tc  # (TB, 1)
    out = jnp.where(col == lab_local, phi, cosine) * S
    out_ref[...] = out.astype(out_ref.dtype)


def arcface_forward(x, weight, label, *, tb: int = 256, tc: int = 1024):
    """x: (B, D) f32, weight: (C, D) f32, label: (B,) int -> (B, C) f32."""
    B, D = x.shape
    C, D2 = weight.shape
    assert D == D2

    # Tile sizes: TB multiple of 8 (sublanes), TC multiple of 128 (lane-dense
    # output -> unmasked stores). Don't tile bigger than the (padded) problem.
    TB = min(tb, _round_up(B, 8))
    TB = _round_up(TB, 8)
    TC = min(tc, _round_up(C, 128))
    TC = _round_up(TC, 128)

    B_pad = _round_up(B, TB)
    C_pad = _round_up(C, TC)

    # Pre-normalize x once in the wrapper (B x D is tiny) and cast to bf16 so
    # the MXU LHS is already in its compute dtype.  Zero-padded rows stay zero.
    x32 = x.astype(jnp.float32)
    inv_x = lax.rsqrt(
        jnp.maximum(jnp.sum(x32 * x32, axis=-1, keepdims=True), EPS * EPS)
    )
    x_n = (x32 * inv_x).astype(jnp.bfloat16)

    x_p = jnp.pad(x_n, ((0, B_pad - B), (0, 0)))
    # Weight stays f32 in HBM (read exactly once per tile with the flipped
    # grid); it is normalized + cast to bf16 inside the kernel.
    w_p = jnp.pad(weight.astype(jnp.float32), ((0, C_pad - C), (0, 0)))
    # Padded label rows get -1 so they never match a real class column.
    lab_p = jnp.pad(
        label.astype(jnp.int32), (0, B_pad - B), constant_values=-1
    ).reshape(B_pad, 1)

    # Outer axis = class tiles (weight-resident, megacore "parallel": ArcFace
    # class counts give many tiles); inner axis = batch tiles ("arbitrary",
    # carries the wn scratch-init dependence).
    grid = (C_pad // TC, B_pad // TB)

    out_p = pl.pallas_call(
        arcface_kernel,
        out_shape=jax.ShapeDtypeStruct((B_pad, C_pad), jnp.float32),
        grid=grid,
        in_specs=[
            pl.BlockSpec((TB, D), lambda j, i: (i, 0)),   # x_n: streamed along B
            pl.BlockSpec((TC, D), lambda j, i: (j, 0)),   # W: resident across B
            pl.BlockSpec((TB, 1), lambda j, i: (i, 0)),   # labels per row-tile
        ],
        out_specs=pl.BlockSpec((TB, TC), lambda j, i: (i, j)),
        scratch_shapes=[pltpu.VMEM((TC, D), jnp.bfloat16)],  # normalized W tile
        compiler_params=pltpu.CompilerParams(
            dimension_semantics=("parallel", "arbitrary"),
            # ~24 MiB used at (TB=256, TC=1024, D=2048); raise the scoped limit
            # (16 MiB default on v5e) while staying under v7x's 64 MiB physical.
            vmem_limit_bytes=48 * 1024 * 1024,
        ),
    )(x_p, w_p, lab_p)

    return out_p[:B, :C]


def _reference(x, weight, label):
    """Mirrors the kernel's precision: f32 normalization, bf16 MXU operands,
    f32 accumulation and f32 epilogue (matches the PyTorch forward otherwise)."""
    x32 = x.astype(jnp.float32)
    w32 = weight.astype(jnp.float32)
    inv_x = lax.rsqrt(
        jnp.maximum(jnp.sum(x32 * x32, axis=-1, keepdims=True), EPS * EPS)
    )
    inv_w = lax.rsqrt(
        jnp.maximum(jnp.sum(w32 * w32, axis=-1, keepdims=True), EPS * EPS)
    )
    x_n = (x32 * inv_x).astype(jnp.bfloat16).astype(jnp.float32)
    w_n = (w32 * inv_w).astype(jnp.bfloat16).astype(jnp.float32)
    cosine = x_n @ w_n.T
    sine = jnp.sqrt(jnp.clip(1.0 - cosine * cosine, 0.0, None))
    phi = cosine * COS_M - sine * SIN_M
    phi = jnp.where(cosine > TH, phi, cosine - MM)
    one_hot = jax.nn.one_hot(label, weight.shape[0], dtype=jnp.float32)
    return (one_hot * phi + (1.0 - one_hot) * cosine) * S


if __name__ == "__main__":
    # Small synthetic shapes consistent with ArcFace(in_features, out_features).
    B, in_features, out_features = 8, 32, 16

    key = jax.random.PRNGKey(0)
    kx, kw, kl = jax.random.split(key, 3)

    # Deterministic xavier_uniform_-style init for weight (out, in).
    bound = math.sqrt(6.0 / (in_features + out_features))
    weight = jax.random.uniform(
        kw, (out_features, in_features), jnp.float32, minval=-bound, maxval=bound
    )
    x = jax.random.normal(kx, (B, in_features), jnp.float32)
    label = jax.random.randint(kl, (B,), 0, out_features, jnp.int32)

    out = arcface_forward(x, weight, label)
    out = jax.block_until_ready(out)

    ref = _reference(x, weight, label)
    assert out.shape == (B, out_features)
    assert jnp.allclose(out, ref, atol=2e-3, rtol=2e-3), "mismatch vs reference"

    print("KERNEL_OK")
</pallas_src>

<mosaic_0001>
module attributes {stable_mosaic.version = 11 : i64} {
  func.func @arcface_kernel(%arg0: i32, %arg1: i32, %arg2: memref<8x32xbf16, #tpu.memory_space<vmem>>, %arg3: memref<128x32xf32, #tpu.memory_space<vmem>>, %arg4: memref<8x1xi32, #tpu.memory_space<vmem>>, %arg5: memref<8x128xf32, #tpu.memory_space<vmem>>, %arg6: memref<128x32xbf16, #tpu.memory_space<vmem>>) attributes {dimension_semantics = [#tpu.dimension_semantics<parallel>, #tpu.dimension_semantics<arbitrary>], iteration_bounds = array<i64: 1, 1>, scalar_prefetch = 0 : i64, scratch_operands = 1 : i64, tpu.core_type = #tpu.core_type<tc>, window_params = [{transform_indices = @transform_0, window_bounds = array<i64: 8, 32>}, {transform_indices = @transform_1, window_bounds = array<i64: 128, 32>}, {transform_indices = @transform_2, window_bounds = array<i64: 8, 1>}, {transform_indices = @transform_3, window_bounds = array<i64: 8, 128>}]} {
    %c0_i32 = arith.constant 0 : i32
    %0 = arith.cmpi eq, %arg1, %c0_i32 : i32
    %1 = arith.extui %0 : i1 to i32
    %c0_i32_0 = arith.constant 0 : i32
    %2 = arith.cmpi ne, %1, %c0_i32_0 : i32
    scf.if %2 {
      %c0_15 = arith.constant 0 : index
      %c0_16 = arith.constant 0 : index
      %33 = vector.load %arg3[%c0_15, %c0_16] : memref<128x32xf32, #tpu.memory_space<vmem>>, vector<128x32xf32>
      %34 = arith.mulf %33, %33 : vector<128x32xf32>
      %cst_17 = arith.constant dense<0.000000e+00> : vector<128xf32>
      %35 = vector.multi_reduction <add>, %34, %cst_17 [1] : vector<128x32xf32> to vector<128xf32>
      %36 = vector.shape_cast %35 : vector<128xf32> to vector<128x1xf32>
      %cst_18 = arith.constant 1.000000e-24 : f32
      %37 = vector.broadcast %cst_18 : f32 to vector<128x1xf32>
      %38 = arith.maximumf %36, %37 : vector<128x1xf32>
      %39 = math.rsqrt %38 : vector<128x1xf32>
      %40 = vector.broadcast %39 : vector<128x1xf32> to vector<128x32xf32>
      %41 = arith.mulf %33, %40 : vector<128x32xf32>
      %42 = arith.truncf %41 : vector<128x32xf32> to vector<128x32xbf16>
      %c0_19 = arith.constant 0 : index
      %c0_20 = arith.constant 0 : index
      %43 = vector.load %arg6[%c0_19, %c0_20] : memref<128x32xbf16, #tpu.memory_space<vmem>>, vector<128x32xbf16>
      tpu.vector_store %arg6[%c0_19, %c0_20], %42 {strides = array<i32>} : memref<128x32xbf16, #tpu.memory_space<vmem>>, vector<128x32xbf16>,
    } else {
    }
    %c0 = arith.constant 0 : index
    %c0_1 = arith.constant 0 : index
    %3 = vector.load %arg2[%c0, %c0_1] : memref<8x32xbf16, #tpu.memory_space<vmem>>, vector<8x32xbf16>
    %c0_2 = arith.constant 0 : index
    %c0_3 = arith.constant 0 : index
    %4 = vector.load %arg6[%c0_2, %c0_3] : memref<128x32xbf16, #tpu.memory_space<vmem>>, vector<128x32xbf16>
    %cst = arith.constant dense<0.000000e+00> : vector<8x128xf32>
    %5 = tpu.matmul %3, %4, %cst {dimension_numbers = #tpu.dot_dimension_numbers<[1], [1], [0], [0], [0, 0, 1, 0], [], []>} : vector<8x32xbf16>, vector<128x32xbf16>, vector<8x128xf32> -> vector<8x128xf32>
    %6 = arith.mulf %5, %5 : vector<8x128xf32>
    %cst_4 = arith.constant 1.000000e+00 : f32
    %7 = vector.broadcast %cst_4 : f32 to vector<8x128xf32>
    %8 = arith.subf %7, %6 : vector<8x128xf32>
    %cst_5 = arith.constant 0.000000e+00 : f32
    %9 = vector.broadcast %cst_5 : f32 to vector<8x128xf32>
    %10 = arith.maximumf %8, %9 : vector<8x128xf32>
    %11 = math.sqrt %10 : vector<8x128xf32>
    %cst_6 = arith.constant 0.87758255 : f32
    %12 = vector.broadcast %cst_6 : f32 to vector<8x128xf32>
    %13 = arith.mulf %5, %12 : vector<8x128xf32>
    %cst_7 = arith.constant 0.47942555 : f32
    %14 = vector.broadcast %cst_7 : f32 to vector<8x128xf32>
    %15 = arith.mulf %11, %14 : vector<8x128xf32>
    %16 = arith.subf %13, %15 : vector<8x128xf32>
    %cst_8 = arith.constant -0.87758255 : f32
    %17 = vector.broadcast %cst_8 : f32 to vector<8x128xf32>
    %18 = arith.cmpf ogt, %5, %17 : vector<8x128xf32>
    %cst_9 = arith.constant 0.239712775 : f32
    %19 = vector.broadcast %cst_9 : f32 to vector<8x128xf32>
    %20 = arith.subf %5, %19 : vector<8x128xf32>
    %21 = arith.select %18, %16, %20 : vector<8x128xi1>, vector<8x128xf32>
    %22 = tpu.iota {dimensions = array<i32: 1>} : vector<8x128xi32>
    %c0_10 = arith.constant 0 : index
    %c0_11 = arith.constant 0 : index
    %23 = vector.load %arg4[%c0_10, %c0_11] : memref<8x1xi32, #tpu.memory_space<vmem>>, vector<8x1xi32>
    %c128_i32 = arith.constant 128 : i32
    %24 = arith.muli %arg0, %c128_i32 : i32
    %25 = vector.broadcast %24 : i32 to vector<8x1xi32>
    %26 = arith.subi %23, %25 : vector<8x1xi32>
    %27 = vector.broadcast %26 : vector<8x1xi32> to vector<8x128xi32>
    %28 = arith.cmpi eq, %22, %27 : vector<8x128xi32>
    %29 = arith.select %28, %21, %5 : vector<8x128xi1>, vector<8x128xf32>
    %cst_12 = arith.constant 3.000000e+01 : f32
    %30 = vector.broadcast %cst_12 : f32 to vector<8x128xf32>
    %31 = arith.mulf %29, %30 : vector<8x128xf32>
    %c0_13 = arith.constant 0 : index
    %c0_14 = arith.constant 0 : index
    %32 = vector.load %arg5[%c0_13, %c0_14] : memref<8x128xf32, #tpu.memory_space<vmem>>, vector<8x128xf32>
    tpu.vector_store %arg5[%c0_13, %c0_14], %31 {strides = array<i32>} : memref<8x128xf32, #tpu.memory_space<vmem>>, vector<8x128xf32>,
    return
  }
  func.func @transform_0(%arg0: i32, %arg1: i32) -> (i32, i32) {
    %c0_i32 = arith.constant 0 : i32
    %c0_i32_0 = arith.constant 0 : i32
    return %arg1, %c0_i32 : i32, i32
  }
  func.func @transform_1(%arg0: i32, %arg1: i32) -> (i32, i32) {
    %c0_i32 = arith.constant 0 : i32
    %c0_i32_0 = arith.constant 0 : i32
    return %arg0, %c0_i32 : i32, i32
  }
  func.func @transform_2(%arg0: i32, %arg1: i32) -> (i32, i32) {
    %c0_i32 = arith.constant 0 : i32
    %c0_i32_0 = arith.constant 0 : i32
    return %arg1, %c0_i32 : i32, i32
  }
  func.func @transform_3(%arg0: i32, %arg1: i32) -> (i32, i32) {
    %c0_i32 = arith.constant 0 : i32
    return %arg1, %arg0 : i32, i32
  }
}

</mosaic_0001>

<bundles_post_ra>
// kernel: tpu_custom_call.1
= control target key start
LH: loop header
LB: loop body
LE: loop exit
PB: predicated region body
PF: predicated region fallthrough
CT: control target
= control target key end

     0   :  { %vm52_vm0 = vcmask 261120   ;;  %s749_s0 = inlined_call_operand.vmem [shape: bf16[8,32], index: 0, kind: input, shape index: {}]   ;;  %s750_s1 = inlined_call_operand.vmem [shape: f32[128,32], index: 1, kind: input, shape index: {}]   ;;  %s751_s2 = inlined_call_operand.vmem [shape: s32[8,1], index: 2, kind: input, shape index: {}]   ;;  %s752_s3 = inlined_call_operand.hbm [shape: f32[8,128], index: 3, kind: output, shape index: {}]  }
   0x1   :  { %v565_v0 = vld [vmem:[%s750_s1 + $0x70] sm:$0xff]  ;;  %v570_v1 = vld [vmem:[%s750_s1 + $0x78] sm:$0xff]  ;;  %v575_v2 = vld [vmem:[%s750_s1 + $0x60] sm:$0xff] }
   0x2   :  { %v50_v3 = vmul.f32 %v565_v0, %v565_v0  ;;  %v51_v4 = vmul.f32 %v570_v1, %v570_v1  ;;  %v48_v5 = vmul.f32 %v575_v2, %v575_v2  ;;  %v586_v6 = vld [vmem:[%s750_s1 + $0x68] sm:$0xff]  ;;  %v593_v8 = vld [vmem:[%s750_s1 + $0x58] sm:$0xff]  ;;  %v598_v9 = vld [vmem:[%s750_s1 + $0x50] sm:$0xff] }
   0x3   :  { %v49_v7 = vmul.f32 %v586_v6, %v586_v6  ;;  %v47_v14 = vmul.f32 %v593_v8, %v593_v8  ;;  %v46_v15 = vmul.f32 %v598_v9, %v598_v9 }
   0x4   :  { %v95_v10 = vsel %vm52_vm0, %v50_v3, 0.0  ;;  %v89_v11 = vsel %vm52_vm0, %v48_v5, 0.0  ;;  %v98_v12 = vsel %vm52_vm0, %v51_v4, 0.0 }
   0x5   :  { %96 = vadd.xlane.f32.xlu0 %v95_v10  ;;  %90 = vadd.xlane.f32.xlu1 %v89_v11  ;;  %v92_v13 = vsel %vm52_vm0, %v49_v7, 0.0 }
   0x6   :  { %8 = vsyncpa [#allocation4], 0  ;;  %v611_v16 = vld [vmem:[%s750_s1 + $0x48] sm:$0xff]  ;;  %v616_v17 = vld [vmem:[%s750_s1 + $0x40] sm:$0xff]  ;;  %v86_v18 = vsel %vm52_vm0, %v47_v14, 0.0  ;;  %v83_v19 = vsel %vm52_vm0, %v46_v15, 0.0 }
   0x7   :  { %v45_v20 = vmul.f32 %v611_v16, %v611_v16  ;;  %v44_v21 = vmul.f32 %v616_v17, %v616_v17  ;;  %v627_v22 = vld [vmem:[%s750_s1 + $0x38] sm:$0xff]  ;;  %v632_v23 = vld [vmem:[%s750_s1 + $0x30] sm:$0xff]  ;;  %v643_v28 = vld [vmem:[%s750_s1 + $0x28] sm:$0xff]  ;;  %v538_v48 = vmov 0.0   ;;  %vm539_vm1 = vmmov 0  }
   0x8   :  { %v43_v26 = vmul.f32 %v627_v22, %v627_v22  ;;  %v42_v27 = vmul.f32 %v632_v23, %v632_v23  ;;  %v648_v29 = vld [vmem:[%s750_s1 + $0x20] sm:$0xff]  ;;  %v41_v32 = vmul.f32 %v643_v28, %v643_v28  ;;  %v659_v34 = vld [vmem:[%s750_s1 + $0x18] sm:$0xff]  ;;  %v664_v35 = vld [vmem:[%s750_s1 + $0x10] sm:$0xff]  ;;  %449 = vmatprep.subr.bf16.mxu0 %v538_v48  ;;  %465 = vmatprep.mubr.msk.bf16.mxu0 %vm539_vm1, %v538_v48  ;;  %v540_v50 = vmov 0  }
   0x9   :  { %99 = vadd.xlane.f32.xlu0 %v98_v12  ;;  %93 = vadd.xlane.f32.xlu1 %v92_v13  ;;  %v80_v24 = vsel %vm52_vm0, %v45_v20, 0.0  ;;  %v77_v25 = vsel %vm52_vm0, %v44_v21, 0.0  ;;  %v40_v33 = vmul.f32 %v648_v29, %v648_v29  ;;  %v39_v38 = vmul.f32 %v659_v34, %v659_v34  ;;  %v675_v40 = vld [vmem:[%s750_s1 + $0x8] sm:$0xff]  ;;  %v680_v41 = vld [vmem:[%s750_s1] sm:$0xff] }
   0xa   :  { %v74_v30 = vsel %vm52_vm0, %v43_v26, 0.0  ;;  %v71_v31 = vsel %vm52_vm0, %v42_v27, 0.0  ;;  %v68_v36 = vsel %vm52_vm0, %v41_v32, 0.0  ;;  %v38_v39 = vmul.f32 %v664_v35, %v664_v35  ;;  %v373_v49 = vld [vmem:[%s751_s2] sm:$0xff]  ;;  %473 = vset.pattern.permute.xlu0 %v540_v50 }
   0xb   :  { %v65_v37 = vsel %vm52_vm0, %v40_v33, 0.0  ;;  %v62_v42 = vsel %vm52_vm0, %v39_v38, 0.0  ;;  %v37_v44 = vmul.f32 %v675_v40, %v675_v40  ;;  %v36_v45 = vmul.f32 %v680_v41, %v680_v41 }
   0xc   :  { %v59_v43 = vsel %vm52_vm0, %v38_v39, 0.0  ;;  %vm213_vm2 = vcmask 257024  }
   0xd   :  { %87 = vadd.xlane.f32.xlu1 %v86_v18  ;;  %84 = vadd.xlane.f32.xlu0 %v83_v19  ;;  %v56_v46 = vsel %vm52_vm0, %v37_v44, 0.0  ;;  %v53_v47 = vsel %vm52_vm0, %v36_v45, 0.0 }
  0x11   :  { %81 = vadd.xlane.f32.xlu1 %v80_v24  ;;  %78 = vadd.xlane.f32.xlu0 %v77_v25 }
  0x15   :  { %75 = vadd.xlane.f32.xlu1 %v74_v30  ;;  %72 = vadd.xlane.f32.xlu0 %v71_v31 }
  0x19   :  { %69 = vadd.xlane.f32.xlu1 %v68_v36  ;;  %66 = vadd.xlane.f32.xlu0 %v65_v37 }
  0x1d   :  { %63 = vadd.xlane.f32.xlu1 %v62_v42  ;;  %60 = vadd.xlane.f32.xlu0 %v59_v43 }
  0x21   :  { %57 = vadd.xlane.f32.xlu1 %v56_v46  ;;  %54 = vadd.xlane.f32.xlu0 %v53_v47 }
  0x37   :  { %378 = vperm.xlu0 %473, %v373_v49  }
  0x8e   :  { %v97_v51 = vpop.xlane.xlu0 %96  ;;  %v91_v52 = vpop.xlane.xlu1 %90 }
  0x8f   :  { %v115_v53 = vmax.f32 %v97_v51, 1e-24  ;;  %v113_v54 = vmax.f32 %v91_v52, 1e-24 }
  0x91   :  { %482 = vrsqrt.f32 %v115_v53 }
  0x92   :  { %v100_v55 = vpop.xlane.xlu0 %99  ;;  %484 = vrsqrt.f32 %v113_v54  ;;  %v94_v56 = vpop.xlane.xlu1 %93 }
  0x93   :  { %v116_v57 = vmax.f32 %v100_v55, 1e-24  ;;  %v114_v58 = vmax.f32 %v94_v56, 1e-24 }
  0x95   :  { %486 = vrsqrt.f32 %v116_v57 }
  0x96   :  { %488 = vrsqrt.f32 %v114_v58  ;;  %v88_v59 = vpop.xlane.xlu1 %87  ;;  %v85_v60 = vpop.xlane.xlu0 %84 }
  0x97   :  { %v112_v61 = vmax.f32 %v88_v59, 1e-24  ;;  %v111_v62 = vmax.f32 %v85_v60, 1e-24 }
  0x99   :  { %490 = vrsqrt.f32 %v112_v61 }
  0x9a   :  { %492 = vrsqrt.f32 %v111_v62  ;;  %v82_v63 = vpop.xlane.xlu1 %81  ;;  %v79_v3 = vpop.xlane.xlu0 %78 }
  0x9b   :  { %v110_v4 = vmax.f32 %v82_v63, 1e-24  ;;  %v109_v5 = vmax.f32 %v79_v3, 1e-24 }
  0x9d   :  { %494 = vrsqrt.f32 %v110_v4 }
  0x9e   :  { %v483_v7 = vpop.eup %482  ;;  %496 = vrsqrt.f32 %v109_v5  ;;  %v76_v10 = vpop.xlane.xlu1 %75 }
  0x9f   :  { %v73_v11 = vpop.xlane.xlu0 %72  ;;  %v485_v12 = vpop.eup %484  ;;  %v147_v13 = vmul.f32 %v483_v7, %v565_v0  ;;  %v108_v14 = vmax.f32 %v76_v10, 1e-24 }
  0xa0   :  { %v107_v15 = vmax.f32 %v73_v11, 1e-24  ;;  %v145_v18 = vmul.f32 %v485_v12, %v575_v2 }
  0xa1   :  { %v438_v19 = vpack.c.bf16 %v147_v13, %v147_v13  ;;  %498 = vrsqrt.f32 %v108_v14 }
  0xa2   :  { %v487_v20 = vpop.eup %486  ;;  %v436_v21 = vpack.c.bf16 %v145_v18, %v145_v18  ;;  %500 = vrsqrt.f32 %v107_v15  ;;  %v70_v24 = vpop.xlane.xlu1 %69 }
  0xa3   :  { %v67_v25 = vpop.xlane.xlu0 %66  ;;  %v489_v26 = vpop.eup %488  ;;  %228 = vst.msk [vmem:[#allocation2 + $0x38] sm:$0xf] %vm213_vm2, %v438_v19  ;;  %v148_v27 = vmul.f32 %v487_v20, %v570_v1  ;;  %v106_v30 = vmax.f32 %v70_v24, 1e-24 }
  0xa4   :  { %v105_v31 = vmax.f32 %v67_v25, 1e-24  ;;  %226 = vst.msk [vmem:[#allocation2 + $0x30] sm:$0xf] %vm213_vm2, %v436_v21  ;;  %v146_v0 = vmul.f32 %v489_v26, %v586_v6 }
  0xa5   :  { %v439_v32 = vpack.c.bf16 %v148_v27, %v148_v27  ;;  %502 = vrsqrt.f32 %v106_v30 }
  0xa6   :  { %v491_v2 = vpop.eup %490  ;;  %v437_v33 = vpack.c.bf16 %v146_v0, %v146_v0  ;;  %504 = vrsqrt.f32 %v105_v31  ;;  %v64_v36 = vpop.xlane.xlu1 %63  ;;  %v230_v0 = vld [vmem:[%s749_s0] sm:$0xf]  ;;  %s541_s0 = smov [#allocation3]  }
  0xa7   :  { %v61_v37 = vpop.xlane.xlu0 %60  ;;  %v493_v38 = vpop.eup %492  ;;  %229 = vst.msk [vmem:[#allocation2 + $0x3c] sm:$0xf] %vm213_vm2, %v439_v32  ;;  %v144_v39 = vmul.f32 %v491_v2, %v593_v8  ;;  %v104_v42 = vmax.f32 %v64_v36, 1e-24  ;;  %s390_s19 = sshll.u32 %s541_s0, 4  ;;  %s391_s19 = int_to_ptr.vmem [resolvable:$true] %s390_s19 }
  0xa8   :  { %v103_v1 = vmax.f32 %v61_v37, 1e-24  ;;  %227 = vst.msk [vmem:[#allocation2 + $0x34] sm:$0xf] %vm213_vm2, %v437_v33  ;;  %v143_v43 = vmul.f32 %v493_v38, %v598_v9  ;;  %s516_s20 = scalar_lea.vmem %s391_s19, 128  ;;  %p521_p1 = scmp.lt.s32.totalorder %s391_s19, %s391_s19 }
  0xa9   :  { %v435_v44 = vpack.c.bf16 %v144_v39, %v144_v39  ;;  %506 = vrsqrt.f32 %v104_v42  ;;  %v371_v42 = vlaneseq  ;;  %p517_p0 = scmp.ne.s32.totalorder %s391_s19, %s516_s20  ;;  %p522_p2 = scmp.lt.s32.totalorder %s516_s20, %s516_s20 }
  0xaa   :  { %v495_v6 = vpop.eup %494  ;;  %v434_v45 = vpack.c.bf16 %v143_v43, %v143_v43  ;;  %508 = vrsqrt.f32 %v103_v1  ;;  %v58_v46 = vpop.xlane.xlu1 %57 }
  0xab   :  { %v55_v47 = vpop.xlane.xlu0 %54  ;;  %v497_v49 = vpop.eup %496  ;;  %225 = vst.msk [vmem:[#allocation2 + $0x2c] sm:$0xf] %vm213_vm2, %v435_v44  ;;  %v142_v50 = vmul.f32 %v495_v6, %v611_v16  ;;  %v102_v51 = vmax.f32 %v58_v46, 1e-24  ;;  %v372_v44 = vand.u32 127, %v371_v42  ;;  %p523_p3 = por %p522_p2, %p521_p1 }
  0xac   :  { %v101_v8 = vmax.f32 %v55_v47, 1e-24  ;;  %224 = vst.msk [vmem:[#allocation2 + $0x28] sm:$0xf] %vm213_vm2, %v434_v45  ;;  %v141_v52 = vmul.f32 %v497_v49, %v616_v17 }
  0xad   :  { %v433_v53 = vpack.c.bf16 %v142_v50, %v142_v50  ;;  %510 = vrsqrt.f32 %v102_v51  ;;  %p524_p4 = pnand %p523_p3, %p517_p0 }
  0xae   :  { %v499_v9 = vpop.eup %498  ;;  %v432_v54 = vpack.c.bf16 %v141_v52, %v141_v52  ;;  %v474_v55 = vld [vmem:[#allocation2 + $0x38] sm:$0xff]   ;;  %512 = vrsqrt.f32 %v101_v8 }
  0xaf   :  { %v501_v56 = vpop.eup %500  ;;  %223 = vst.msk [vmem:[#allocation2 + $0x24] sm:$0xf] %vm213_vm2, %v433_v53  ;;  %v140_v57 = vmul.f32 %v499_v9, %v627_v22  ;;  %v313_v16 = vsel %vm52_vm0, %v474_v55, 0  ;;  %v475_v22 = vld [vmem:[#allocation2 + $0x30] sm:$0xff]  }
  0xb0   :  { %222 = vst.msk [vmem:[#allocation2 + $0x20] sm:$0xf] %vm213_vm2, %v432_v54  ;;  %v139_v58 = vmul.f32 %v501_v56, %v632_v23  ;;  %450 = vmatpush3.bf16.xpose.msra.mxu0 %v313_v16  ;;  %v310_v10 = vsel %vm52_vm0, %v475_v22, 0 }
  0xb1   :  { %v431_v59 = vpack.c.bf16 %v140_v57, %v140_v57  ;;  %451 = vmatprep.subr.bf16.mxu0 %v538_v48 }
  0xb2   :  { %v503_v17 = vpop.eup %502  ;;  %v430_v60 = vpack.c.bf16 %v139_v58, %v139_v58  ;;  %v379_v45 = vpop.permute.xlu0 %378 }
  0xb3   :  { %v505_v61 = vpop.eup %504  ;;  %221 = vst.msk [vmem:[#allocation2 + $0x1c] sm:$0xf] %vm213_vm2, %v431_v59  ;;  %v138_v62 = vmul.f32 %v503_v17, %v643_v28  ;;  %vm380_vm5 = vcmp.eq.s32.totalorder %v372_v44, %v379_v45 }
  0xb4   :  { %220 = vst.msk [vmem:[#allocation2 + $0x18] sm:$0xf] %vm213_vm2, %v430_v60  ;;  %v137_v63 = vmul.f32 %v505_v61, %v648_v29  ;;  %v476_v29 = vld [vmem:[#allocation2 + $0x28] sm:$0xff]  }
  0xb5   :  { %v429_v3 = vpack.c.bf16 %v138_v62, %v138_v62  ;;  %v307_v19 = vsel %vm52_vm0, %v476_v29, 0 }
  0xb6   :  { %v507_v4 = vpop.eup %506  ;;  %v428_v5 = vpack.c.bf16 %v137_v63, %v137_v63 }
  0xb7   :  { %v509_v23 = vpop.eup %508  ;;  %219 = vst.msk [vmem:[#allocation2 + $0x14] sm:$0xf] %vm213_vm2, %v429_v3  ;;  %v136_v7 = vmul.f32 %v507_v4, %v659_v34  ;;  %v477_v20 = vld [vmem:[#allocation2 + $0x20] sm:$0xff]  }
  0xb8   :  { %218 = vst.msk [vmem:[#allocation2 + $0x10] sm:$0xf] %vm213_vm2, %v428_v5  ;;  %v135_v11 = vmul.f32 %v509_v23, %v664_v35  ;;  %452 = vmatpush3.bf16.xpose.msra.mxu0 %v310_v10  ;;  %v304_v21 = vsel %vm52_vm0, %v477_v20, 0 }
  0xb9   :  { %v427_v28 = vpack.c.bf16 %v136_v7, %v136_v7  ;;  %453 = vmatprep.subr.bf16.mxu0 %v538_v48 }
  0xba   :  { %v511_v12 = vpop.eup %510  ;;  %v426_v13 = vpack.c.bf16 %v135_v11, %v135_v11 }
  0xbb   :  { %v513_v14 = vpop.eup %512  ;;  %217 = vst.msk [vmem:[#allocation2 + $0xc] sm:$0xf] %vm213_vm2, %v427_v28  ;;  %v134_v15 = vmul.f32 %v511_v12, %v675_v40  ;;  %v478_v40 = vld [vmem:[#allocation2 + $0x18] sm:$0xff]  }
  0xbc   :  { %216 = vst.msk [vmem:[#allocation2 + $0x8] sm:$0xf] %vm213_vm2, %v426_v13  ;;  %v133_v34 = vmul.f32 %v513_v14, %v680_v41  ;;  %v301_v41 = vsel %vm52_vm0, %v478_v40, 0 }
  0xbd   :  { %v425_v18 = vpack.c.bf16 %v134_v15, %v134_v15 }
  0xbe   :  { %v424_v35 = vpack.c.bf16 %v133_v34, %v133_v34 }
  0xbf   :  { %215 = vst.msk [vmem:[#allocation2 + $0x4] sm:$0xf] %vm213_vm2, %v425_v18  ;;  %v479_v24 = vld [vmem:[#allocation2 + $0x10] sm:$0xff]  }
  0xc0   :  { %214 = vst.msk [vmem:[#allocation2] sm:$0xf] %vm213_vm2, %v424_v35  ;;  %454 = vmatpush3.bf16.xpose.msra.mxu0 %v307_v19  ;;  %v298_v25 = vsel %vm52_vm0, %v479_v24, 0 }
  0xc1   :  { %455 = vmatprep.subr.bf16.mxu0 %v538_v48 }
  0xc3   :  { %v480_v26 = vld [vmem:[#allocation2 + $0x8] sm:$0xff]  }
  0xc4   :  { %v295_v27 = vsel %vm52_vm0, %v480_v26, 0 }
  0xc7   :  { %v481_v30 = vld [vmem:[#allocation2] sm:$0xff]  }
  0xc8   :  { %456 = vmatpush3.bf16.xpose.msra.mxu0 %v304_v21  ;;  %v292_v31 = vsel %vm52_vm0, %v481_v30, 0 }
  0xc9   :  { %457 = vmatprep.subr.bf16.mxu0 %v538_v48 }
  0xd0   :  { %458 = vmatpush3.bf16.xpose.msra.mxu0 %v301_v41 }
  0xd1   :  { %459 = vmatprep.subr.bf16.mxu0 %v538_v48 }
  0xd8   :  { %460 = vmatpush3.bf16.xpose.msra.mxu0 %v298_v25 }
  0xd9   :  { %461 = vmatprep.subr.bf16.mxu0 %v538_v48 }
  0xe0   :  { %462 = vmatpush3.bf16.xpose.msra.mxu0 %v295_v27 }
  0xe1   :  { %463 = vmatprep.subr.bf16.mxu0 %v538_v48 }
  0xe8   :  { %464 = vmatpush3.bf16.xpose.msra.mxu0 %v292_v31 }
  0xef   :  { %466 = vmatmul.mubr.msk.bf16.vlgmr.msra.gmra.mxu0 %vm52_vm0, %v230_v0 }
 0x1af   :  { %v349_v32 = vpop.f32.mrf.mxu0 }
 0x1b0   :  { %v355_v2 = vmul.f32 %v349_v32, %v349_v32  ;;  %v365_v47 = vmul.f32 0.87758255, %v349_v32  ;;  %v423_v50 = vadd.f32 -0.23971277, %v349_v32  ;;  %vm368_vm6 = vcmp.gt.f32.partialorder %v349_v32, -0.87758255 }
 0x1b1   :  { %v467_v33 = vpop.f32.mrf.mxu0 }
 0x1b2   :  { %v356_v36 = vsub.f32 1.0, %v355_v2 }
 0x1b3   :  { %v352_v37 = vpop.f32.mrf.mxu0 }
 0x1b4   :  { %v357_v38 = vmax.f32 %v356_v36, 0.0 }
 0x1b5   :  { %v468_v39 = vpop.f32.mrf.mxu0 }
 0x1b6   :  { %514 = vrsqrt.f32 %v357_v38  ;;  %vm360_vm3 = vcmp.eq.f32.partialorder %v357_v38, inf  ;;  %v363_v43 = vand.u32 2147483648, %v357_v38  ;;  %vm362_vm4 = vcmp.eq.f32.partialorder %v357_v38, 0.0 }
 0x1c3   :  { %v515_v48 = vpop.eup %514 }
 0x1c4   :  { %v359_v1 = vmul.f32 %v515_v48, %v357_v38 }
 0x1c6   :  { %v361_v6 = vsel %vm360_vm3, %v357_v38, %v359_v1 }
 0x1c7   :  { %v364_v46 = vsel %vm362_vm4, %v363_v43, %v361_v6 }
 0x1c8   :  { %v366_v49 = vmul.f32 0.47942555, %v364_v46 }
 0x1ca   :  { %v367_v51 = vsub.f32 %v365_v47, %v366_v49 }
 0x1cc   :  { %v370_v8 = vsel %vm368_vm6, %v367_v51, %v423_v50 }
 0x1cd   :  { %v381_v52 = vsel %vm380_vm5, %v370_v8, %v349_v32 }
 0x1ce   :  { %v382_v53 = vmul.f32 30.0, %v381_v52 }
 0x1d0   :  { %383 = vst [vmem:[#allocation3] sm:$0xff] %v382_v53 }
 0x1d1   :  { %527 = shalt.err (!%p524_p4)
}
 0x1d2   :  { %393 = dma.vmem_to_hbm [thread:$0]  %s391_s19, 128, %s752_s3, [#allocation4]  }
 0x1d3   :  { %536 = dma.done.wait [#allocation4], 128  }
 0x1d4   :  { %537 = vsyncadd [#allocation4], 4294967168 }
 0x1d5   :  { %397 = vsyncpa [#allocation4], 1 }

</bundles_post_ra>
